<compile_context>
chip_gen: v6e
topology: v6e:2x2x1
jax: 0.10.0
libtpu: 0.0.40
codegen_flags: <defaults>
</compile_context>

<pallas_src>
import numpy as np
import jax
import jax.numpy as jnp
from jax.experimental import pallas as pl
from jax.experimental.pallas import tpu as pltpu

LN_EPS = 1e-5      # torch.nn.LayerNorm default
NEG_BIG = -1e30    # finite causal-mask value (avoids -inf -> NaN hazards)


def _layernorm(x, gamma, beta):
    mu = jnp.mean(x, axis=-1, keepdims=True)
    var = jnp.mean((x - mu) ** 2, axis=-1, keepdims=True)
    return (x - mu) * jax.lax.rsqrt(var + LN_EPS) * gamma + beta


def _pick_q_tile(T):
    """Largest q-tile <= 128 that divides T (sublane-friendly); else full T."""
    if T <= 128:
        return T
    for cand in (128, 64, 32, 16, 8):
        if T % cand == 0:
            return cand
    return T


def _vmem_limit_bytes():
    """Generation-aware scoped-VMEM limit."""
    try:
        kind = jax.devices()[0].device_kind.lower()
    except Exception:
        kind = ""
    if "v5" in kind or "v6" in kind:      # 128 MiB physical VMEM parts
        return 96 * 1024 * 1024
    return 32 * 1024 * 1024               # v7x (64 MiB physical) / safe default


def block_forward(x, params, num_head):
    B, T, E = x.shape
    H = num_head
    hs = E // H
    Hid = 4 * E
    tq = _pick_q_tile(T)
    n_qt = T // tq
    bf16 = jnp.bfloat16

    def block_kernel(x_q_ref, x_full_ref,
                     ln1_g_ref, ln1_b_ref,
                     wq_ref, wkv_ref, wo_ref, bo_ref,
                     ln2_g_ref, ln2_b_ref,
                     w1_ref, b1_ref, w2_ref, b2_ref,
                     out_ref,
                     q_s_ref, kv_s_ref, o_s_ref):
        qi = pl.program_id(1)
        x_q = x_q_ref[0].astype(jnp.float32)        # (tq, E) query-tile rows
        x_full = x_full_ref[0].astype(jnp.float32)  # (T, E) full sequence (K/V)
        scale = E ** (-0.5)   # NOTE: PyTorch scales by C**-0.5 with C = num_embed

        # ---- LayerNorm 1 ----
        g1, b1 = ln1_g_ref[0], ln1_b_ref[0]
        xn_f = _layernorm(x_full, g1, b1).astype(bf16)           # (T, E)
        if n_qt == 1:
            xn_q = xn_f                                           # avoid recompute
        else:
            xn_q = _layernorm(x_q, g1, b1).astype(bf16)           # (tq, E)

        # ---- Fused lane-dense projections (full MXU width/depth) ----
        q2d = jnp.dot(xn_q, wq_ref[...], preferred_element_type=jnp.float32)
        q_s_ref[...] = (q2d * scale).astype(bf16)                 # fold E**-0.5 into Q
        kv2d = jnp.dot(xn_f, wkv_ref[...], preferred_element_type=jnp.float32)
        kv_s_ref[...] = kv2d.astype(bf16)                         # (T, 2E): [K | V]

        # Head split via ref-slice loads of the staging buffers.
        q = jnp.stack([q_s_ref[:, h * hs:(h + 1) * hs] for h in range(H)], axis=0)
        k = jnp.stack([kv_s_ref[:, h * hs:(h + 1) * hs] for h in range(H)], axis=0)
        v = jnp.stack([kv_s_ref[:, E + h * hs:E + (h + 1) * hs] for h in range(H)],
                      axis=0)                                     # (H, T, hs) bf16

        # ---- Causal attention, complete-row softmax per query tile ----
        s = jnp.einsum('htd,hkd->htk', q, k,
                       preferred_element_type=jnp.float32)        # (H, tq, T)
        row = jax.lax.broadcasted_iota(jnp.int32, (1, tq, T), 1) + qi * tq
        col = jax.lax.broadcasted_iota(jnp.int32, (1, tq, T), 2)
        s = jnp.where(row >= col, s, NEG_BIG)

        m = jnp.max(s, axis=-1, keepdims=True)
        p = jnp.exp(s - m)                                        # unnormalised probs
        r = jnp.sum(p, axis=-1, keepdims=True)                    # (H, tq, 1)
        o = jnp.einsum('htk,hkd->htd', p.astype(bf16), v,
                       preferred_element_type=jnp.float32)        # (H, tq, hs)
        # Deferred softmax normalisation on the small (H, tq, hs) tensor.
        o = (o * pl.reciprocal(r, approx=True)).astype(bf16)

        # Head merge (lane concat via scratch stores) + ONE (tq,E)@(E,E) out-proj.
        for h in range(H):
            o_s_ref[:, h * hs:(h + 1) * hs] = o[h]
        attn = jnp.dot(o_s_ref[...], wo_ref[...],
                       preferred_element_type=jnp.float32) + bo_ref[0]

        x1 = x_q + attn                                           # residual (f32)

        # ---- LayerNorm 2 + feed-forward ----
        x1n = _layernorm(x1, ln2_g_ref[0], ln2_b_ref[0]).astype(bf16)
        hdn = jnp.dot(x1n, w1_ref[...], preferred_element_type=jnp.float32) + b1_ref[0]
        hdn = jnp.maximum(hdn, 0.0).astype(bf16)                  # ReLU
        ff = jnp.dot(hdn, w2_ref[...], preferred_element_type=jnp.float32) + b2_ref[0]

        out_ref[0] = (x1 + ff).astype(out_ref.dtype)

    full = lambda shape: pl.BlockSpec(shape, lambda b, qi: (0,) * len(shape))

    in_specs = [
        pl.BlockSpec((1, tq, E), lambda b, qi: (b, qi, 0)),   # x, query tile
        pl.BlockSpec((1, T, E), lambda b, qi: (b, 0, 0)),     # x, full seq (K/V)
        full((1, E)), full((1, E)),                           # ln1 gamma / beta
        full((E, E)),                                         # W_q   (bf16)
        full((E, 2 * E)),                                     # W_kv  (bf16)
        full((E, E)), full((1, E)),                           # W_o (bf16), b_o
        full((1, E)), full((1, E)),                           # ln2 gamma / beta
        full((E, Hid)), full((1, Hid)),                       # W_1 (bf16), b_1
        full((Hid, E)), full((1, E)),                         # W_2 (bf16), b_2
    ]

    weight_bytes = 12 * E * E * 2                             # all bf16 weights
    cost = pl.CostEstimate(
        flops=int(B * ((20 + 4 * n_qt) * T * E * E + 4 * T * T * E)),
        transcendentals=int(B * H * T * T),
        bytes_accessed=int(B * T * E * 4 * (2 + n_qt) + weight_bytes),
    )

    fn = pl.pallas_call(
        block_kernel,
        out_shape=jax.ShapeDtypeStruct((B, T, E), x.dtype),
        grid_spec=pltpu.PrefetchScalarGridSpec(
            num_scalar_prefetch=0,
            grid=(B, n_qt),
            in_specs=in_specs,
            out_specs=pl.BlockSpec((1, tq, E), lambda b, qi: (b, qi, 0)),
            scratch_shapes=[
                pltpu.VMEM((tq, E), bf16),       # Q staging (head split)
                pltpu.VMEM((T, 2 * E), bf16),    # K/V staging (head split)
                pltpu.VMEM((tq, E), bf16),       # head-concat staging (out-proj)
            ],
        ),
        compiler_params=pltpu.CompilerParams(
            dimension_semantics=("parallel", "parallel"),
            vmem_limit_bytes=_vmem_limit_bytes(),
        ),
        cost_estimate=cost,
    )
    return fn(x, x,
              params["ln1_g"], params["ln1_b"],
              params["w_q"], params["w_kv"], params["w_o"], params["bo"],
              params["ln2_g"], params["ln2_b"],
              params["w1"], params["b1"], params["w2"], params["b2"])


def block_reference(x, p, num_head):
    """Pure-JAX f32 reference mirroring the PyTorch Block.forward (eval mode)."""
    def ln(v, g, b):
        mu = v.mean(-1, keepdims=True)
        var = ((v - mu) ** 2).mean(-1, keepdims=True)
        return (v - mu) / jnp.sqrt(var + LN_EPS) * g + b

    f32 = lambda a: a.astype(jnp.float32)
    B, T, E = x.shape
    H = num_head
    hs = E // H

    xn = ln(x, p["ln1_g"][0], p["ln1_b"][0])
    q = xn @ f32(p["w_q"])
    kv = xn @ f32(p["w_kv"])
    k, v = kv[..., :E], kv[..., E:]
    causal = jnp.tril(jnp.ones((T, T), bool))
    heads = []
    for h in range(H):
        sl = slice(h * hs, (h + 1) * hs)
        s = jnp.einsum("btd,bsd->bts", q[..., sl], k[..., sl]) * (E ** -0.5)
        s = jnp.where(causal, s, -jnp.inf)
        w = jax.nn.softmax(s, axis=-1)
        heads.append(jnp.einsum("bts,bsd->btd", w, v[..., sl]))
    sa = jnp.concatenate(heads, axis=-1) @ f32(p["w_o"]) + p["bo"][0]
    x1 = x + sa
    x1n = ln(x1, p["ln2_g"][0], p["ln2_b"][0])
    ff = jnp.maximum(x1n @ f32(p["w1"]) + p["b1"][0], 0.0) @ f32(p["w2"]) + p["b2"][0]
    return x1 + ff


def init_params(key, num_embed, num_head):
    E = num_embed
    Hid = 4 * E
    ks = jax.random.split(key, 8)
    s = 0.02
    bf = jnp.bfloat16
    return {
        "ln1_g": jnp.ones((1, E), jnp.float32),
        "ln1_b": jnp.zeros((1, E), jnp.float32),
        "w_q": (s * jax.random.normal(ks[0], (E, E), jnp.float32)).astype(bf),
        "w_kv": (s * jax.random.normal(ks[1], (E, 2 * E), jnp.float32)).astype(bf),
        "w_o": (s * jax.random.normal(ks[2], (E, E), jnp.float32)).astype(bf),
        "bo": s * jax.random.normal(ks[3], (1, E), jnp.float32),
        "ln2_g": jnp.ones((1, E), jnp.float32),
        "ln2_b": jnp.zeros((1, E), jnp.float32),
        "w1": (s * jax.random.normal(ks[4], (E, Hid), jnp.float32)).astype(bf),
        "b1": jnp.zeros((1, Hid), jnp.float32),
        "w2": (s * jax.random.normal(ks[5], (Hid, E), jnp.float32)).astype(bf),
        "b2": jnp.zeros((1, E), jnp.float32),
    }


if __name__ == "__main__":
    root = jax.random.PRNGKey(0)
    k_x1, k_p1, k_x2, k_p2 = jax.random.split(root, 4)

    # Small smoke test (single q-tile path).
    B, T, E, H = 2, 8, 32, 4
    x = jax.random.normal(k_x1, (B, T, E), jnp.float32)
    params = init_params(k_p1, E, H)
    out = jax.block_until_ready(block_forward(x, params, H))
    ref = jax.block_until_ready(block_reference(x, params, H))
    # bf16 MXU matmuls + approx reciprocal vs. f32 reference -> loose tolerance.
    np.testing.assert_allclose(np.asarray(out), np.asarray(ref),
                               rtol=1e-2, atol=1e-2)

    # Production-shape check (block_size=256, num_embed=384, 6 heads):
    # exercises the q-tile grid axis (tq=128, two tiles) and hs=64 head layout.
    Bp, Tp, Ep, Hp = 2, 256, 384, 6
    xp = jax.random.normal(k_x2, (Bp, Tp, Ep), jnp.float32)
    pparams = init_params(k_p2, Ep, Hp)
    outp = jax.block_until_ready(block_forward(xp, pparams, Hp))
    refp = jax.block_until_ready(block_reference(xp, pparams, Hp))
    np.testing.assert_allclose(np.asarray(outp), np.asarray(refp),
                               rtol=2e-2, atol=2e-2)

    print("KERNEL_OK")
</pallas_src>

<mosaic_0001>
module attributes {stable_mosaic.version = 11 : i64} {
  func.func @block_kernel(%arg0: i32, %arg1: i32, %arg2: memref<1x8x32xf32, #tpu.memory_space<vmem>>, %arg3: memref<1x8x32xf32, #tpu.memory_space<vmem>>, %arg4: memref<1x32xf32, #tpu.memory_space<vmem>>, %arg5: memref<1x32xf32, #tpu.memory_space<vmem>>, %arg6: memref<32x32xbf16, #tpu.memory_space<vmem>>, %arg7: memref<32x64xbf16, #tpu.memory_space<vmem>>, %arg8: memref<32x32xbf16, #tpu.memory_space<vmem>>, %arg9: memref<1x32xf32, #tpu.memory_space<vmem>>, %arg10: memref<1x32xf32, #tpu.memory_space<vmem>>, %arg11: memref<1x32xf32, #tpu.memory_space<vmem>>, %arg12: memref<32x128xbf16, #tpu.memory_space<vmem>>, %arg13: memref<1x128xf32, #tpu.memory_space<vmem>>, %arg14: memref<128x32xbf16, #tpu.memory_space<vmem>>, %arg15: memref<1x32xf32, #tpu.memory_space<vmem>>, %arg16: memref<1x8x32xf32, #tpu.memory_space<vmem>>, %arg17: memref<8x32xbf16, #tpu.memory_space<vmem>>, %arg18: memref<8x64xbf16, #tpu.memory_space<vmem>>, %arg19: memref<8x32xbf16, #tpu.memory_space<vmem>>) attributes {dimension_semantics = [#tpu.dimension_semantics<parallel>, #tpu.dimension_semantics<parallel>], iteration_bounds = array<i64: 2, 1>, scalar_prefetch = 0 : i64, scratch_operands = 3 : i64, tpu.core_type = #tpu.core_type<tc>, window_params = [{transform_indices = @transform_0, window_bounds = array<i64: 1, 8, 32>}, {transform_indices = @transform_1, window_bounds = array<i64: 1, 8, 32>}, {pipeline_mode = #tpu.pipeline_mode<synchronous>, transform_indices = @transform_2, window_bounds = array<i64: 1, 32>}, {pipeline_mode = #tpu.pipeline_mode<synchronous>, transform_indices = @transform_3, window_bounds = array<i64: 1, 32>}, {pipeline_mode = #tpu.pipeline_mode<synchronous>, transform_indices = @transform_4, window_bounds = array<i64: 32, 32>}, {pipeline_mode = #tpu.pipeline_mode<synchronous>, transform_indices = @transform_5, window_bounds = array<i64: 32, 64>}, {pipeline_mode = #tpu.pipeline_mode<synchronous>, transform_indices = @transform_6, window_bounds = array<i64: 32, 32>}, {pipeline_mode = #tpu.pipeline_mode<synchronous>, transform_indices = @transform_7, window_bounds = array<i64: 1, 32>}, {pipeline_mode = #tpu.pipeline_mode<synchronous>, transform_indices = @transform_8, window_bounds = array<i64: 1, 32>}, {pipeline_mode = #tpu.pipeline_mode<synchronous>, transform_indices = @transform_9, window_bounds = array<i64: 1, 32>}, {pipeline_mode = #tpu.pipeline_mode<synchronous>, transform_indices = @transform_10, window_bounds = array<i64: 32, 128>}, {pipeline_mode = #tpu.pipeline_mode<synchronous>, transform_indices = @transform_11, window_bounds = array<i64: 1, 128>}, {pipeline_mode = #tpu.pipeline_mode<synchronous>, transform_indices = @transform_12, window_bounds = array<i64: 128, 32>}, {pipeline_mode = #tpu.pipeline_mode<synchronous>, transform_indices = @transform_13, window_bounds = array<i64: 1, 32>}, {transform_indices = @transform_14, window_bounds = array<i64: 1, 8, 32>}]} {
    %c0 = arith.constant 0 : index
    %c0_0 = arith.constant 0 : index
    %c0_1 = arith.constant 0 : index
    %0 = vector.load %arg2[%c0, %c0_0, %c0_1] : memref<1x8x32xf32, #tpu.memory_space<vmem>>, vector<1x8x32xf32>
    %1 = vector.shape_cast %0 : vector<1x8x32xf32> to vector<8x32xf32>
    %c0_2 = arith.constant 0 : index
    %c0_3 = arith.constant 0 : index
    %c0_4 = arith.constant 0 : index
    %2 = vector.load %arg3[%c0_2, %c0_3, %c0_4] : memref<1x8x32xf32, #tpu.memory_space<vmem>>, vector<1x8x32xf32>
    %3 = vector.shape_cast %2 : vector<1x8x32xf32> to vector<8x32xf32>
    %c0_5 = arith.constant 0 : index
    %c0_6 = arith.constant 0 : index
    %4 = vector.load %arg4[%c0_5, %c0_6] : memref<1x32xf32, #tpu.memory_space<vmem>>, vector<1x32xf32>
    %5 = vector.shape_cast %4 : vector<1x32xf32> to vector<32xf32>
    %c0_7 = arith.constant 0 : index
    %c0_8 = arith.constant 0 : index
    %6 = vector.load %arg5[%c0_7, %c0_8] : memref<1x32xf32, #tpu.memory_space<vmem>>, vector<1x32xf32>
    %7 = vector.shape_cast %6 : vector<1x32xf32> to vector<32xf32>
    %cst = arith.constant dense<0.000000e+00> : vector<8xf32>
    %8 = vector.multi_reduction <add>, %3, %cst [1] : vector<8x32xf32> to vector<8xf32>
    %9 = vector.shape_cast %8 : vector<8xf32> to vector<8x1xf32>
    %cst_9 = arith.constant 3.200000e+01 : f32
    %10 = vector.broadcast %cst_9 : f32 to vector<8x1xf32>
    %11 = arith.divf %9, %10 : vector<8x1xf32>
    %12 = vector.broadcast %11 : vector<8x1xf32> to vector<8x32xf32>
    %13 = arith.subf %3, %12 : vector<8x32xf32>
    %14 = arith.mulf %13, %13 : vector<8x32xf32>
    %cst_10 = arith.constant dense<0.000000e+00> : vector<8xf32>
    %15 = vector.multi_reduction <add>, %14, %cst_10 [1] : vector<8x32xf32> to vector<8xf32>
    %16 = vector.shape_cast %15 : vector<8xf32> to vector<8x1xf32>
    %cst_11 = arith.constant 3.200000e+01 : f32
    %17 = vector.broadcast %cst_11 : f32 to vector<8x1xf32>
    %18 = arith.divf %16, %17 : vector<8x1xf32>
    %19 = vector.broadcast %11 : vector<8x1xf32> to vector<8x32xf32>
    %20 = arith.subf %3, %19 : vector<8x32xf32>
    %cst_12 = arith.constant 9.99999974E-6 : f32
    %21 = vector.broadcast %cst_12 : f32 to vector<8x1xf32>
    %22 = arith.addf %18, %21 : vector<8x1xf32>
    %23 = math.rsqrt %22 : vector<8x1xf32>
    %24 = vector.broadcast %23 : vector<8x1xf32> to vector<8x32xf32>
    %25 = arith.mulf %20, %24 : vector<8x32xf32>
    %26 = vector.shape_cast %5 : vector<32xf32> to vector<1x32xf32>
    %27 = vector.broadcast %26 : vector<1x32xf32> to vector<8x32xf32>
    %28 = arith.mulf %25, %27 : vector<8x32xf32>
    %29 = vector.shape_cast %7 : vector<32xf32> to vector<1x32xf32>
    %30 = vector.broadcast %29 : vector<1x32xf32> to vector<8x32xf32>
    %31 = arith.addf %28, %30 : vector<8x32xf32>
    %32 = arith.truncf %31 : vector<8x32xf32> to vector<8x32xbf16>
    %c0_13 = arith.constant 0 : index
    %c0_14 = arith.constant 0 : index
    %33 = vector.load %arg6[%c0_13, %c0_14] : memref<32x32xbf16, #tpu.memory_space<vmem>>, vector<32x32xbf16>
    %cst_15 = arith.constant dense<0.000000e+00> : vector<8x32xf32>
    %34 = tpu.matmul %32, %33, %cst_15 {dimension_numbers = #tpu.dot_dimension_numbers<[1], [0], [0], [1], [0, 0, 1, 1], [], []>} : vector<8x32xbf16>, vector<32x32xbf16>, vector<8x32xf32> -> vector<8x32xf32>
    %cst_16 = arith.constant 0.176776692 : f32
    %35 = vector.broadcast %cst_16 : f32 to vector<8x32xf32>
    %36 = arith.mulf %34, %35 : vector<8x32xf32>
    %37 = arith.truncf %36 : vector<8x32xf32> to vector<8x32xbf16>
    %c0_17 = arith.constant 0 : index
    %c0_18 = arith.constant 0 : index
    %38 = vector.load %arg17[%c0_17, %c0_18] : memref<8x32xbf16, #tpu.memory_space<vmem>>, vector<8x32xbf16>
    tpu.vector_store %arg17[%c0_17, %c0_18], %37 {strides = array<i32>} : memref<8x32xbf16, #tpu.memory_space<vmem>>, vector<8x32xbf16>,
    %c0_19 = arith.constant 0 : index
    %c0_20 = arith.constant 0 : index
    %39 = vector.load %arg7[%c0_19, %c0_20] : memref<32x64xbf16, #tpu.memory_space<vmem>>, vector<32x64xbf16>
    %cst_21 = arith.constant dense<0.000000e+00> : vector<8x64xf32>
    %40 = tpu.matmul %32, %39, %cst_21 {dimension_numbers = #tpu.dot_dimension_numbers<[1], [0], [0], [1], [0, 0, 1, 1], [], []>} : vector<8x32xbf16>, vector<32x64xbf16>, vector<8x64xf32> -> vector<8x64xf32>
    %41 = arith.truncf %40 : vector<8x64xf32> to vector<8x64xbf16>
    %c0_22 = arith.constant 0 : index
    %c0_23 = arith.constant 0 : index
    %42 = vector.load %arg18[%c0_22, %c0_23] : memref<8x64xbf16, #tpu.memory_space<vmem>>, vector<8x64xbf16>
    tpu.vector_store %arg18[%c0_22, %c0_23], %41 {strides = array<i32>} : memref<8x64xbf16, #tpu.memory_space<vmem>>, vector<8x64xbf16>,
    %c0_24 = arith.constant 0 : index
    %c0_25 = arith.constant 0 : index
    %43 = vector.load %arg17[%c0_24, %c0_25] : memref<8x32xbf16, #tpu.memory_space<vmem>>, vector<8x8xbf16>
    %c0_26 = arith.constant 0 : index
    %c8 = arith.constant 8 : index
    %44 = vector.load %arg17[%c0_26, %c8] : memref<8x32xbf16, #tpu.memory_space<vmem>>, vector<8x8xbf16>
    %c0_27 = arith.constant 0 : index
    %c16 = arith.constant 16 : index
    %45 = vector.load %arg17[%c0_27, %c16] : memref<8x32xbf16, #tpu.memory_space<vmem>>, vector<8x8xbf16>
    %c0_28 = arith.constant 0 : index
    %c24 = arith.constant 24 : index
    %46 = vector.load %arg17[%c0_28, %c24] : memref<8x32xbf16, #tpu.memory_space<vmem>>, vector<8x8xbf16>
    %47 = vector.shape_cast %43 : vector<8x8xbf16> to vector<1x8x8xbf16>
    %48 = vector.shape_cast %44 : vector<8x8xbf16> to vector<1x8x8xbf16>
    %49 = vector.shape_cast %45 : vector<8x8xbf16> to vector<1x8x8xbf16>
    %50 = vector.shape_cast %46 : vector<8x8xbf16> to vector<1x8x8xbf16>
    %51 = tpu.concatenate %47, %48, %49, %50 in 0 : vector<1x8x8xbf16>, vector<1x8x8xbf16>, vector<1x8x8xbf16>, vector<1x8x8xbf16> -> vector<4x8x8xbf16>
    %c0_29 = arith.constant 0 : index
    %c0_30 = arith.constant 0 : index
    %52 = vector.load %arg18[%c0_29, %c0_30] : memref<8x64xbf16, #tpu.memory_space<vmem>>, vector<8x8xbf16>
    %c0_31 = arith.constant 0 : index
    %c8_32 = arith.constant 8 : index
    %53 = vector.load %arg18[%c0_31, %c8_32] : memref<8x64xbf16, #tpu.memory_space<vmem>>, vector<8x8xbf16>
    %c0_33 = arith.constant 0 : index
    %c16_34 = arith.constant 16 : index
    %54 = vector.load %arg18[%c0_33, %c16_34] : memref<8x64xbf16, #tpu.memory_space<vmem>>, vector<8x8xbf16>
    %c0_35 = arith.constant 0 : index
    %c24_36 = arith.constant 24 : index
    %55 = vector.load %arg18[%c0_35, %c24_36] : memref<8x64xbf16, #tpu.memory_space<vmem>>, vector<8x8xbf16>
    %56 = vector.shape_cast %52 : vector<8x8xbf16> to vector<1x8x8xbf16>
    %57 = vector.shape_cast %53 : vector<8x8xbf16> to vector<1x8x8xbf16>
    %58 = vector.shape_cast %54 : vector<8x8xbf16> to vector<1x8x8xbf16>
    %59 = vector.shape_cast %55 : vector<8x8xbf16> to vector<1x8x8xbf16>
    %60 = tpu.concatenate %56, %57, %58, %59 in 0 : vector<1x8x8xbf16>, vector<1x8x8xbf16>, vector<1x8x8xbf16>, vector<1x8x8xbf16> -> vector<4x8x8xbf16>
    %c0_37 = arith.constant 0 : index
    %c32 = arith.constant 32 : index
    %61 = vector.load %arg18[%c0_37, %c32] : memref<8x64xbf16, #tpu.memory_space<vmem>>, vector<8x8xbf16>
    %c0_38 = arith.constant 0 : index
    %c40 = arith.constant 40 : index
    %62 = vector.load %arg18[%c0_38, %c40] : memref<8x64xbf16, #tpu.memory_space<vmem>>, vector<8x8xbf16>
    %c0_39 = arith.constant 0 : index
    %c48 = arith.constant 48 : index
    %63 = vector.load %arg18[%c0_39, %c48] : memref<8x64xbf16, #tpu.memory_space<vmem>>, vector<8x8xbf16>
    %c0_40 = arith.constant 0 : index
    %c56 = arith.constant 56 : index
    %64 = vector.load %arg18[%c0_40, %c56] : memref<8x64xbf16, #tpu.memory_space<vmem>>, vector<8x8xbf16>
    %65 = vector.shape_cast %61 : vector<8x8xbf16> to vector<1x8x8xbf16>
    %66 = vector.shape_cast %62 : vector<8x8xbf16> to vector<1x8x8xbf16>
    %67 = vector.shape_cast %63 : vector<8x8xbf16> to vector<1x8x8xbf16>
    %68 = vector.shape_cast %64 : vector<8x8xbf16> to vector<1x8x8xbf16>
    %69 = tpu.concatenate %65, %66, %67, %68 in 0 : vector<1x8x8xbf16>, vector<1x8x8xbf16>, vector<1x8x8xbf16>, vector<1x8x8xbf16> -> vector<4x8x8xbf16>
    "tpu.trace_start"() <{level = 10 : i32, message = "htd,hkd->htk"}> : () -> ()
    %cst_41 = arith.constant dense<0.000000e+00> : vector<4x8x8xf32>
    %70 = tpu.matmul %51, %60, %cst_41 {dimension_numbers = #tpu.dot_dimension_numbers<[2], [2], [1], [1], [0, 0, 0, 1, 1, 1], [0], [0]>} : vector<4x8x8xbf16>, vector<4x8x8xbf16>, vector<4x8x8xf32> -> vector<4x8x8xf32>
    "tpu.trace_stop"() : () -> ()
    %71 = tpu.iota {dimensions = array<i32: 1>} : vector<1x8x8xi32>
    %c8_i32 = arith.constant 8 : i32
    %72 = arith.muli %arg1, %c8_i32 : i32
    %73 = vector.broadcast %72 : i32 to vector<1x8x8xi32>
    %74 = arith.addi %71, %73 : vector<1x8x8xi32>
    %75 = tpu.iota {dimensions = array<i32: 2>} : vector<1x8x8xi32>
    %76 = arith.cmpi sge, %74, %75 : vector<1x8x8xi32>
    %cst_42 = arith.constant -1.000000e+30 : f32
    %77 = vector.shape_cast %76 : vector<1x8x8xi1> to vector<1x8x8xi1>
    %78 = vector.broadcast %77 : vector<1x8x8xi1> to vector<4x8x8xi1>
    %79 = vector.broadcast %cst_42 : f32 to vector<4x8x8xf32>
    %80 = arith.select %78, %70, %79 : vector<4x8x8xi1>, vector<4x8x8xf32>
    %cst_43 = arith.constant dense<0xFF800000> : vector<4x8xf32>
    %81 = vector.multi_reduction <maximumf>, %80, %cst_43 [2] : vector<4x8x8xf32> to vector<4x8xf32>
    %82 = vector.shape_cast %81 : vector<4x8xf32> to vector<4x8x1xf32>
    %83 = vector.broadcast %82 : vector<4x8x1xf32> to vector<4x8x8xf32>
    %84 = arith.subf %80, %83 : vector<4x8x8xf32>
    %85 = math.exp %84 : vector<4x8x8xf32>
    %cst_44 = arith.constant dense<0.000000e+00> : vector<4x8xf32>
    %86 = vector.multi_reduction <add>, %85, %cst_44 [2] : vector<4x8x8xf32> to vector<4x8xf32>
    %87 = vector.shape_cast %86 : vector<4x8xf32> to vector<4x8x1xf32>
    %88 = arith.truncf %85 : vector<4x8x8xf32> to vector<4x8x8xbf16>
    "tpu.trace_start"() <{level = 10 : i32, message = "htk,hkd->htd"}> : () -> ()
    %cst_45 = arith.constant dense<0.000000e+00> : vector<4x8x8xf32>
    %89 = tpu.matmul %88, %69, %cst_45 {dimension_numbers = #tpu.dot_dimension_numbers<[2], [1], [1], [2], [0, 0, 0, 1, 1, 2], [0], [0]>} : vector<4x8x8xbf16>, vector<4x8x8xbf16>, vector<4x8x8xf32> -> vector<4x8x8xf32>
    "tpu.trace_stop"() : () -> ()
    %90 = tpu.reciprocal %87 {approx = true} : vector<4x8x1xf32> -> vector<4x8x1xf32>
    %91 = vector.broadcast %90 : vector<4x8x1xf32> to vector<4x8x8xf32>
    %92 = arith.mulf %89, %91 : vector<4x8x8xf32>
    %93 = arith.truncf %92 : vector<4x8x8xf32> to vector<4x8x8xbf16>
    %94 = vector.extract_strided_slice %93 {offsets = [0, 0, 0], sizes = [1, 8, 8], strides = [1, 1, 1]} : vector<4x8x8xbf16> to vector<1x8x8xbf16>
    %95 = vector.shape_cast %94 : vector<1x8x8xbf16> to vector<8x8xbf16>
    %c0_46 = arith.constant 0 : index
    %c0_47 = arith.constant 0 : index
    %96 = vector.load %arg19[%c0_46, %c0_47] : memref<8x32xbf16, #tpu.memory_space<vmem>>, vector<8x8xbf16>
    tpu.vector_store %arg19[%c0_46, %c0_47], %95 {strides = array<i32>} : memref<8x32xbf16, #tpu.memory_space<vmem>>, vector<8x8xbf16>,
    %97 = vector.extract_strided_slice %93 {offsets = [1, 0, 0], sizes = [1, 8, 8], strides = [1, 1, 1]} : vector<4x8x8xbf16> to vector<1x8x8xbf16>
    %98 = vector.shape_cast %97 : vector<1x8x8xbf16> to vector<8x8xbf16>
    %c0_48 = arith.constant 0 : index
    %c8_49 = arith.constant 8 : index
    %99 = vector.load %arg19[%c0_48, %c8_49] : memref<8x32xbf16, #tpu.memory_space<vmem>>, vector<8x8xbf16>
    tpu.vector_store %arg19[%c0_48, %c8_49], %98 {strides = array<i32>} : memref<8x32xbf16, #tpu.memory_space<vmem>>, vector<8x8xbf16>,
    %100 = vector.extract_strided_slice %93 {offsets = [2, 0, 0], sizes = [1, 8, 8], strides = [1, 1, 1]} : vector<4x8x8xbf16> to vector<1x8x8xbf16>
    %101 = vector.shape_cast %100 : vector<1x8x8xbf16> to vector<8x8xbf16>
    %c0_50 = arith.constant 0 : index
    %c16_51 = arith.constant 16 : index
    %102 = vector.load %arg19[%c0_50, %c16_51] : memref<8x32xbf16, #tpu.memory_space<vmem>>, vector<8x8xbf16>
    tpu.vector_store %arg19[%c0_50, %c16_51], %101 {strides = array<i32>} : memref<8x32xbf16, #tpu.memory_space<vmem>>, vector<8x8xbf16>,
    %103 = vector.extract_strided_slice %93 {offsets = [3, 0, 0], sizes = [1, 8, 8], strides = [1, 1, 1]} : vector<4x8x8xbf16> to vector<1x8x8xbf16>
    %104 = vector.shape_cast %103 : vector<1x8x8xbf16> to vector<8x8xbf16>
    %c0_52 = arith.constant 0 : index
    %c24_53 = arith.constant 24 : index
    %105 = vector.load %arg19[%c0_52, %c24_53] : memref<8x32xbf16, #tpu.memory_space<vmem>>, vector<8x8xbf16>
    tpu.vector_store %arg19[%c0_52, %c24_53], %104 {strides = array<i32>} : memref<8x32xbf16, #tpu.memory_space<vmem>>, vector<8x8xbf16>,
    %c0_54 = arith.constant 0 : index
    %c0_55 = arith.constant 0 : index
    %106 = vector.load %arg19[%c0_54, %c0_55] : memref<8x32xbf16, #tpu.memory_space<vmem>>, vector<8x32xbf16>
    %c0_56 = arith.constant 0 : index
    %c0_57 = arith.constant 0 : index
    %107 = vector.load %arg8[%c0_56, %c0_57] : memref<32x32xbf16, #tpu.memory_space<vmem>>, vector<32x32xbf16>
    %cst_58 = arith.constant dense<0.000000e+00> : vector<8x32xf32>
    %108 = tpu.matmul %106, %107, %cst_58 {dimension_numbers = #tpu.dot_dimension_numbers<[1], [0], [0], [1], [0, 0, 1, 1], [], []>} : vector<8x32xbf16>, vector<32x32xbf16>, vector<8x32xf32> -> vector<8x32xf32>
    %c0_59 = arith.constant 0 : index
    %c0_60 = arith.constant 0 : index
    %109 = vector.load %arg9[%c0_59, %c0_60] : memref<1x32xf32, #tpu.memory_space<vmem>>, vector<1x32xf32>
    %110 = vector.shape_cast %109 : vector<1x32xf32> to vector<32xf32>
    %111 = vector.shape_cast %110 : vector<32xf32> to vector<1x32xf32>
    %112 = vector.broadcast %111 : vector<1x32xf32> to vector<8x32xf32>
    %113 = arith.addf %108, %112 : vector<8x32xf32>
    %114 = arith.addf %1, %113 : vector<8x32xf32>
    %c0_61 = arith.constant 0 : index
    %c0_62 = arith.constant 0 : index
    %115 = vector.load %arg10[%c0_61, %c0_62] : memref<1x32xf32, #tpu.memory_space<vmem>>, vector<1x32xf32>
    %116 = vector.shape_cast %115 : vector<1x32xf32> to vector<32xf32>
    %c0_63 = arith.constant 0 : index
    %c0_64 = arith.constant 0 : index
    %117 = vector.load %arg11[%c0_63, %c0_64] : memref<1x32xf32, #tpu.memory_space<vmem>>, vector<1x32xf32>
    %118 = vector.shape_cast %117 : vector<1x32xf32> to vector<32xf32>
    %cst_65 = arith.constant dense<0.000000e+00> : vector<8xf32>
    %119 = vector.multi_reduction <add>, %114, %cst_65 [1] : vector<8x32xf32> to vector<8xf32>
    %120 = vector.shape_cast %119 : vector<8xf32> to vector<8x1xf32>
    %cst_66 = arith.constant 3.200000e+01 : f32
    %121 = vector.broadcast %cst_66 : f32 to vector<8x1xf32>
    %122 = arith.divf %120, %121 : vector<8x1xf32>
    %123 = vector.broadcast %122 : vector<8x1xf32> to vector<8x32xf32>
    %124 = arith.subf %114, %123 : vector<8x32xf32>
    %125 = arith.mulf %124, %124 : vector<8x32xf32>
    %cst_67 = arith.constant dense<0.000000e+00> : vector<8xf32>
    %126 = vector.multi_reduction <add>, %125, %cst_67 [1] : vector<8x32xf32> to vector<8xf32>
    %127 = vector.shape_cast %126 : vector<8xf32> to vector<8x1xf32>
    %cst_68 = arith.constant 3.200000e+01 : f32
    %128 = vector.broadcast %cst_68 : f32 to vector<8x1xf32>
    %129 = arith.divf %127, %128 : vector<8x1xf32>
    %130 = vector.broadcast %122 : vector<8x1xf32> to vector<8x32xf32>
    %131 = arith.subf %114, %130 : vector<8x32xf32>
    %cst_69 = arith.constant 9.99999974E-6 : f32
    %132 = vector.broadcast %cst_69 : f32 to vector<8x1xf32>
    %133 = arith.addf %129, %132 : vector<8x1xf32>
    %134 = math.rsqrt %133 : vector<8x1xf32>
    %135 = vector.broadcast %134 : vector<8x1xf32> to vector<8x32xf32>
    %136 = arith.mulf %131, %135 : vector<8x32xf32>
    %137 = vector.shape_cast %116 : vector<32xf32> to vector<1x32xf32>
    %138 = vector.broadcast %137 : vector<1x32xf32> to vector<8x32xf32>
    %139 = arith.mulf %136, %138 : vector<8x32xf32>
    %140 = vector.shape_cast %118 : vector<32xf32> to vector<1x32xf32>
    %141 = vector.broadcast %140 : vector<1x32xf32> to vector<8x32xf32>
    %142 = arith.addf %139, %141 : vector<8x32xf32>
    %143 = arith.truncf %142 : vector<8x32xf32> to vector<8x32xbf16>
    %c0_70 = arith.constant 0 : index
    %c0_71 = arith.constant 0 : index
    %144 = vector.load %arg12[%c0_70, %c0_71] : memref<32x128xbf16, #tpu.memory_space<vmem>>, vector<32x128xbf16>
    %cst_72 = arith.constant dense<0.000000e+00> : vector<8x128xf32>
    %145 = tpu.matmul %143, %144, %cst_72 {dimension_numbers = #tpu.dot_dimension_numbers<[1], [0], [0], [1], [0, 0, 1, 1], [], []>} : vector<8x32xbf16>, vector<32x128xbf16>, vector<8x128xf32> -> vector<8x128xf32>
    %c0_73 = arith.constant 0 : index
    %c0_74 = arith.constant 0 : index
    %146 = vector.load %arg13[%c0_73, %c0_74] : memref<1x128xf32, #tpu.memory_space<vmem>>, vector<1x128xf32>
    %147 = vector.shape_cast %146 : vector<1x128xf32> to vector<128xf32>
    %148 = vector.shape_cast %147 : vector<128xf32> to vector<1x128xf32>
    %149 = vector.broadcast %148 : vector<1x128xf32> to vector<8x128xf32>
    %150 = arith.addf %145, %149 : vector<8x128xf32>
    %cst_75 = arith.constant 0.000000e+00 : f32
    %151 = vector.broadcast %cst_75 : f32 to vector<8x128xf32>
    %152 = arith.maximumf %150, %151 : vector<8x128xf32>
    %153 = arith.truncf %152 : vector<8x128xf32> to vector<8x128xbf16>
    %c0_76 = arith.constant 0 : index
    %c0_77 = arith.constant 0 : index
    %154 = vector.load %arg14[%c0_76, %c0_77] : memref<128x32xbf16, #tpu.memory_space<vmem>>, vector<128x32xbf16>
    %cst_78 = arith.constant dense<0.000000e+00> : vector<8x32xf32>
    %155 = tpu.matmul %153, %154, %cst_78 {dimension_numbers = #tpu.dot_dimension_numbers<[1], [0], [0], [1], [0, 0, 1, 1], [], []>} : vector<8x128xbf16>, vector<128x32xbf16>, vector<8x32xf32> -> vector<8x32xf32>
    %c0_79 = arith.constant 0 : index
    %c0_80 = arith.constant 0 : index
    %156 = vector.load %arg15[%c0_79, %c0_80] : memref<1x32xf32, #tpu.memory_space<vmem>>, vector<1x32xf32>
    %157 = vector.shape_cast %156 : vector<1x32xf32> to vector<32xf32>
    %158 = vector.shape_cast %157 : vector<32xf32> to vector<1x32xf32>
    %159 = vector.broadcast %158 : vector<1x32xf32> to vector<8x32xf32>
    %160 = arith.addf %155, %159 : vector<8x32xf32>
    %161 = arith.addf %114, %160 : vector<8x32xf32>
    %c0_81 = arith.constant 0 : index
    %c0_82 = arith.constant 0 : index
    %c0_83 = arith.constant 0 : index
    %162 = vector.load %arg16[%c0_81, %c0_82, %c0_83] : memref<1x8x32xf32, #tpu.memory_space<vmem>>, vector<1x8x32xf32>
    %163 = vector.shape_cast %162 : vector<1x8x32xf32> to vector<8x32xf32>
    %164 = vector.shape_cast %161 : vector<8x32xf32> to vector<1x8x32xf32>
    tpu.vector_store %arg16[%c0_81, %c0_82, %c0_83], %164 {strides = array<i32>} : memref<1x8x32xf32, #tpu.memory_space<vmem>>, vector<1x8x32xf32>,
    return
  }
  func.func @transform_0(%arg0: i32, %arg1: i32) -> (i32, i32, i32) {
    %c0_i32 = arith.constant 0 : i32
    %c0_i32_0 = arith.constant 0 : i32
    return %arg0, %arg1, %c0_i32 : i32, i32, i32
  }
  func.func @transform_1(%arg0: i32, %arg1: i32) -> (i32, i32, i32) {
    %c0_i32 = arith.constant 0 : i32
    %c0_i32_0 = arith.constant 0 : i32
    %c0_i32_1 = arith.constant 0 : i32
    return %arg0, %c0_i32, %c0_i32_0 : i32, i32, i32
  }
  func.func @transform_2(%arg0: i32, %arg1: i32) -> (i32, i32) {
    %c0_i32 = arith.constant 0 : i32
    %c0_i32_0 = arith.constant 0 : i32
    %c0_i32_1 = arith.constant 0 : i32
    return %c0_i32, %c0_i32_0 : i32, i32
  }
  func.func @transform_3(%arg0: i32, %arg1: i32) -> (i32, i32) {
    %c0_i32 = arith.constant 0 : i32
    %c0_i32_0 = arith.constant 0 : i32
    %c0_i32_1 = arith.constant 0 : i32
    return %c0_i32, %c0_i32_0 : i32, i32
  }
  func.func @transform_4(%arg0: i32, %arg1: i32) -> (i32, i32) {
    %c0_i32 = arith.constant 0 : i32
    %c0_i32_0 = arith.constant 0 : i32
    %c0_i32_1 = arith.constant 0 : i32
    return %c0_i32, %c0_i32_0 : i32, i32
  }
  func.func @transform_5(%arg0: i32, %arg1: i32) -> (i32, i32) {
    %c0_i32 = arith.constant 0 : i32
    %c0_i32_0 = arith.constant 0 : i32
    %c0_i32_1 = arith.constant 0 : i32
    return %c0_i32, %c0_i32_0 : i32, i32
  }
  func.func @transform_6(%arg0: i32, %arg1: i32) -> (i32, i32) {
    %c0_i32 = arith.constant 0 : i32
    %c0_i32_0 = arith.constant 0 : i32
    %c0_i32_1 = arith.constant 0 : i32
    return %c0_i32, %c0_i32_0 : i32, i32
  }
  func.func @transform_7(%arg0: i32, %arg1: i32) -> (i32, i32) {
    %c0_i32 = arith.constant 0 : i32
    %c0_i32_0 = arith.constant 0 : i32
    %c0_i32_1 = arith.constant 0 : i32
    return %c0_i32, %c0_i32_0 : i32, i32
  }
  func.func @transform_8(%arg0: i32, %arg1: i32) -> (i32, i32) {
    %c0_i32 = arith.constant 0 : i32
    %c0_i32_0 = arith.constant 0 : i32
    %c0_i32_1 = arith.constant 0 : i32
    return %c0_i32, %c0_i32_0 : i32, i32
  }
  func.func @transform_9(%arg0: i32, %arg1: i32) -> (i32, i32) {
    %c0_i32 = arith.constant 0 : i32
    %c0_i32_0 = arith.constant 0 : i32
    %c0_i32_1 = arith.constant 0 : i32
    return %c0_i32, %c0_i32_0 : i32, i32
  }
  func.func @transform_10(%arg0: i32, %arg1: i32) -> (i32, i32) {
    %c0_i32 = arith.constant 0 : i32
    %c0_i32_0 = arith.constant 0 : i32
    %c0_i32_1 = arith.constant 0 : i32
    return %c0_i32, %c0_i32_0 : i32, i32
  }
  func.func @transform_11(%arg0: i32, %arg1: i32) -> (i32, i32) {
    %c0_i32 = arith.constant 0 : i32
    %c0_i32_0 = arith.constant 0 : i32
    %c0_i32_1 = arith.constant 0 : i32
    return %c0_i32, %c0_i32_0 : i32, i32
  }
  func.func @transform_12(%arg0: i32, %arg1: i32) -> (i32, i32) {
    %c0_i32 = arith.constant 0 : i32
    %c0_i32_0 = arith.constant 0 : i32
    %c0_i32_1 = arith.constant 0 : i32
    return %c0_i32, %c0_i32_0 : i32, i32
  }
  func.func @transform_13(%arg0: i32, %arg1: i32) -> (i32, i32) {
    %c0_i32 = arith.constant 0 : i32
    %c0_i32_0 = arith.constant 0 : i32
    %c0_i32_1 = arith.constant 0 : i32
    return %c0_i32, %c0_i32_0 : i32, i32
  }
  func.func @transform_14(%arg0: i32, %arg1: i32) -> (i32, i32, i32) {
    %c0_i32 = arith.constant 0 : i32
    %c0_i32_0 = arith.constant 0 : i32
    return %arg0, %arg1, %c0_i32 : i32, i32, i32
  }
}

</mosaic_0001>

<bundles_post_ra>
// kernel: tpu_custom_call.1
= control target key start
LH: loop header
LB: loop body
LE: loop exit
PB: predicated region body
PF: predicated region fallthrough
CT: control target
= control target key end

     0   :  { %19 = vsyncpa [#allocation6], 0  ;;  %s2461_s0 = inlined_call_operand.vmem [shape: f32[2,8,32], index: 0, kind: input, shape index: {}]   ;;  %s2462_s1 = inlined_call_operand.vmem [shape: f32[2,8,32], index: 1, kind: input, shape index: {}]   ;;  %s2463_s2 = inlined_call_operand.vmem [shape: f32[1,32], index: 2, kind: input, shape index: {}]   ;;  %s2464_s3 = inlined_call_operand.vmem [shape: f32[1,32], index: 3, kind: input, shape index: {}]   ;;  %s2465_s4 = inlined_call_operand.vmem [shape: bf16[32,32], index: 4, kind: input, shape index: {}]   ;;  %s2466_s5 = inlined_call_operand.vmem [shape: bf16[32,64], index: 5, kind: input, shape index: {}]   ;;  %s2467_s6 = inlined_call_operand.vmem [shape: bf16[32,32], index: 6, kind: input, shape index: {}]   ;;  %s2468_s7 = inlined_call_operand.vmem [shape: f32[1,32], index: 7, kind: input, shape index: {}]   ;;  %s2469_s8 = inlined_call_operand.vmem [shape: f32[1,32], index: 8, kind: input, shape index: {}]   ;;  %s2470_s9 = inlined_call_operand.vmem [shape: f32[1,32], index: 9, kind: input, shape index: {}]   ;;  %s2471_s10 = inlined_call_operand.hbm [shape: bf16[32,128], index: 10, kind: input, shape index: {}]   ;;  %s2472_s11 = inlined_call_operand.hbm [shape: f32[1,128], index: 11, kind: input, shape index: {}]   ;;  %s2473_s12 = inlined_call_operand.vmem [shape: bf16[128,32], index: 12, kind: input, shape index: {}]   ;;  %s2474_s13 = inlined_call_operand.vmem [shape: f32[1,32], index: 13, kind: input, shape index: {}]   ;;  %s2475_s14 = inlined_call_operand.hbm [shape: f32[2,8,32], index: 14, kind: output, shape index: {}]  }
   0x1   :  { %20 = vsyncpa [#allocation9], 0 }
   0x2   :  { %21 = vsyncpa [#allocation7], 0 }
   0x3   :  { %23 = vsyncpa [#allocation7 + $0x1], 0  ;;  %s2132_s29 = smov 0   ;;  %s2134_s30 = smov 0  }
   0x4   :  { %s2136_s15 = smov 0   ;;  %s2138_s16 = smov 0  }
   0x5   :  { %s2140_s17 = smov 0   ;;  %s2142_s18 = smov 0  }
   0x6 LB: > { %2483 = sst [smem:[#allocation14_spill]] %s2021_s29  ;;  %s1583_s19 = sadd.s32 4294967295, %s2041_s18   ;;  %s2041_s18 = sphi %s2142_s18, %s29_s18   ;;  %s2037_s17 = sphi %s2140_s17, %s2502_s17   ;;  %s2033_s16 = sphi %s2138_s16, %s2501_s16   ;;  %s2029_s15 = sphi %s2136_s15, %s2500_s15   ;;  %s2025_s30 = sphi %s2134_s30, %s2504_s30   ;;  %s2021_s29 = sphi %s2132_s29, %s2503_s29  }
   0x7   : > { %2484 = sst [smem:[#allocation15_spill]] %s2029_s15  ;;  %s1584_s20 = sadd.s32 4294967294, %s2041_s18  }
   0x8   : > { %2485 = sst [smem:[#allocation16_spill]] %s2037_s17  ;;  %s41_s21 = sadd.s32 1, %s2037_s17 }
   0x9   : > { %2486 = sst [smem:[#allocation17_spill]] %s2041_s18  ;;  %s356_s22 = sadd.s32 1, %s2029_s15 }
   0xa   : > { %p43_p0 = scmp.ge.s32.totalorder %s41_s21, 2  ;;  %p366_p1 = scmp.ne.s32.totalorder %s2029_s15, %s2025_s30 }
   0xb   : > { %p367_p2 = scmp.eq.s32.totalorder %s1583_s19, 1  ;;  %p372_p3 = scmp.ne.s32.totalorder %s2025_s30, %s2021_s29 }
   0xc   : > { %s2506_s21 = smov (%p43_p0, %s41_s21), 0  ;;  %p373_p5 = scmp.eq.s32.totalorder %s1584_s20, 1 }
   0xd   : > { %2487 = sst [smem:[#allocation18_spill]] %s2506_s21  ;;  %p2172_p4 = por %p367_p2, %p366_p1 }
   0xe   : > { %s351_s24 = ssub.s32 %s2037_s17, %s2506_s21  ;;  %p1585_p6 = scmp.ge.s32.totalorder %s2041_s18, 1 }
   0xf   : > { %p354_p7 = scmp.eq.s32.totalorder %s351_s24, 0  ;;  %p2179_p8 = por %p373_p5, %p372_p3 }
  0x10   : > { %p380_p9 = scmp.lt.s32.totalorder %s2041_s18, 3  ;;  %p2191_p11 = scmp.eq.s32.totalorder %s1583_s19, 0 }
  0x11   : > { %s2489_s25 = scalar_select %p2179_p8, 1, 0 }
  0x12   : > { %s2185_s26 = scalar_select %p354_p7, %s2029_s15, %s356_s22  }
  0x13   : > { %2490 = sst [smem:[#allocation19_spill]] %s2489_s25  ;;  %p2187_p10 = pnand %p1585_p6, %p380_p9 }
  0x14   : > { %2491 = sst [smem:[#allocation20_spill]] %s2185_s26  ;;  %s2043_s20 = smov [#allocation5]  }
  0x15   : > { %p1791_p12 = pneg %p2187_p10  ;;  %s416_s24 = sshll.u32 %s2043_s20, 4  ;;  %s417_s24 = int_to_ptr.vmem [resolvable:$true] %s416_s24 }
  0x16   : > { %s2044_s22 = smov [#allocation8]   ;;  %s1916_s19 = scalar_lea.vmem %s417_s24, 256 }
  0x17   : > { %p2199_p13 = pnand %p2191_p11, %p1791_p12  ;;  %s430_s17 = sshll.u32 %s2044_s22, 4  ;;  %s431_s17 = int_to_ptr.vmem [resolvable:$true] %s430_s17 }
  0x18   : > { %p1917_p1 = scmp.ne.s32.totalorder %s417_s24, %s1916_s19  ;;  %p1924_p5 = scmp.lt.s32.totalorder %s417_s24, %s417_s24 }
  0x19   : > { %p1907_p0 = pneg %p2199_p13  ;;  %p1925_p6 = scmp.lt.s32.totalorder %s1916_s19, %s1916_s19 }
  0x1b   : > { %p1919_p2 = pnand %p1917_p1, %p1907_p0  ;;  %p1926_p7 = por %p1925_p6, %p1924_p5 }
  0x1d   : > { %p1920_p3 = pneg %p1919_p2 }
  0x1f   : > { %p1927_p9 = pnand %p1926_p7, %p1920_p3 }
  0x21   : > { %1930 = shalt.err (!%p1927_p9)
}
  0x22   : > { %s2045_s20 = smov 64   ;;  %s2046_s26 = smov 4  }
  0x23   : > { %1794 = dma.hbm_to_vmem [thread:$0]  (!%p2199_p13), %s2471_s10, 256, %s417_s24, [#allocation6], %s2045_s20, %s2045_s20, %s2046_s26  }
  0x24   : > { %s1942_s25 = scalar_lea.vmem %s431_s17, 16  ;;  %s1949_s29 = scalar_lea.vmem %s431_s17, 32 }
  0x25   : > { %p1943_p12 = scmp.ne.s32.totalorder %s431_s17, %s1942_s25  ;;  %p1950_p8 = scmp.lt.s32.totalorder %s431_s17, %s431_s17 }
  0x26   : > { %p1951_p5 = scmp.lt.s32.totalorder %s1949_s29, %s1942_s25 }
  0x27   : > { %p1945_p1 = pnand %p1943_p12, %p1907_p0 }
  0x28   : > { %p1952_p3 = por %p1951_p5, %p1950_p8 }
  0x29   : > { %p1946_p2 = pneg %p1945_p1 }
  0x2b   : > { %p1953_p6 = pnand %p1952_p3, %p1946_p2 }
  0x2d   : > { %1956 = shalt.err (!%p1953_p6)
}
  0x2e   : > { %1797 = dma.hbm_to_vmem [thread:$0]  (!%p2199_p13), %s2472_s11, 16, %s431_s17, [#allocation9]  }
  0x2f   : > { %466 = sbr.rel (%p2187_p10) target bundleno = 2304 (0x900), region = 76 }
  0x34   : > { %2008 = dma.done.wait (%p2191_p11), [#allocation6], 256  }
  0x35   : > { %2010 = vsyncadd (%p2191_p11), [#allocation6], 4294967040 }
  0x36   : > { %2012 = dma.done.wait (%p2191_p11), [#allocation9], 16  }
  0x37   : > { %2014 = vsyncadd (%p2191_p11), [#allocation9], 4294967280  ;;  %p522_p8 = scmp.lt.s32.totalorder %s2033_s16, 1  ;;  %vm538_vm0 = vcmask 261120   ;;  %v1868_v7 = vld [vmem:[%s2465_s4 + $0x8] sm:$0xff]   ;;  %v2047_v8 = vmov 0.0   ;;  %v891_v45 = vlaneseq }
  0x38   : > { %1681 = vmatprep.subr.bf16.mxu1 %v2047_v8  ;;  %vm2048_vm1 = vmmov 0   ;;  %v1869_v9 = vld [vmem:[%s2465_s4] sm:$0xff]   ;;  %1709 = vmatprep.subr.bf16.mxu0 %v2047_v8  ;;  %v1870_v19 = vld [vmem:[%s2466_s5 + $0x8] sm:$0xff]   ;;  %vm629_vm2 = vcmask 257024   ;;  %vm688_vm3 = vcmask 519168   ;;  %s2049_s26 = smov 120  }
  0x39   : > { %s2233_s29 = scalar_select %p522_p8, %s2033_s16, 1  ;;  %1685 = vmatprep.mubr.msk.bf16.mxu1 %vm2048_vm1, %v2047_v8  ;;  %1682 = vmatpush3.bf16.msra.mxu1 %v1868_v7  ;;  %v1595_v14 = vld [vmem:[%s2463_s2] ss:$0 sm:$0xff]  ;;  %vm706_vm4 = vcmask 64512   ;;  %v892_v46 = vshrl.u32 %v891_v45, 7  ;;  %v897_v47 = vand.u32 127, %v891_v45 }
  0x3a   : > { %1683 = vmatprep.subr.bf16.mxu1 %v2047_v8  ;;  %1711 = vmatprep.mubr.msk.bf16.mxu0 %vm2048_vm1, %v2047_v8  ;;  %v1596_v16 = vld [vmem:[%s2464_s3] ss:$0 sm:$0xff]  ;;  %s2050_s27 = smov 112   ;;  %s2051_s28 = smov 104   ;;  %vm952_vm6 = vcmask 1043456   ;;  %vm1158_vm7 = vcmask 60416  }
  0x3b   : > { %s1593_s15 = sshll.u32 %s2233_s29, 3  ;;  %v1871_v21 = vld [vmem:[%s2466_s5] sm:$0xff]   ;;  %vm898_vm5 = vcmp.ge.s32.totalorder %v892_v46, %v897_v47  ;;  %s2052_s24 = smov 96   ;;  %vm1166_vm8 = vcmask 126016   ;;  %vm1174_vm9 = vcmask 191616   ;;  %vm1182_vm10 = vcmask 257216  }
  0x3c   : > { %s532_s21 = scalar_lea.vmem %s2462_s1, %s1593_s15  ;;  %s2053_s18 = smov 8  }
  0x3d   : > { %v535_v0 = vld [vmem:[%s532_s21] sm:$0xff]  ;;  %1684 = vmatpush3.bf16.msra.mxu1 %v1869_v9  ;;  %s2054_s21 = smov 16   ;;  %s2055_s25 = smov 24  }
  0x3e   : > { %v539_v1 = vsel %vm538_vm0, %v535_v0, 0.0  ;;  %1689 = vmatprep.subr.bf16.mxu1 %v2047_v8 }
  0x3f   : > { %540 = vadd.xlane.f32.xlu0 %v539_v1 }
  0xc8   : > { %v541_v2 = vpop.xlane.xlu0 %540 }
  0xc9   : > { %v543_v3 = vmul.f32 0.03125, %v541_v2 }
  0xcb   : > { %v544_v4 = vsub.f32 %v535_v0, %v543_v3 }
  0xcd   : > { %v545_v5 = vmul.f32 %v544_v4, %v544_v4 }
  0xcf   : > { %v546_v6 = vsel %vm538_vm0, %v545_v5, 0.0 }
  0xd0   : > { %547 = vadd.xlane.f32.xlu0 %v546_v6 }
 0x159   : > { %v548_v10 = vpop.xlane.xlu0 %547 }
 0x15a   : > { %v549_v11 = vmul.f32 0.03125, %v548_v10 }
 0x15c   : > { %v550_v12 = vadd.f32 1e-05, %v549_v11 }
 0x15e   : > { %1885 = vrsqrt.f32 %v550_v12 }
 0x16b   : > { %v1886_v13 = vpop.eup %1885 }
 0x16c   : > { %v552_v15 = vmul.f32 %v1886_v13, %v544_v4 }
 0x16e   : > { %v559_v17 = vmul.f32 %v1595_v14, %v552_v15 }
 0x170   : > { %v566_v18 = vadd.f32 %v1596_v16, %v559_v17 }
 0x172   : > { %v567_v20 = vpack.c.bf16 %v566_v18, %v566_v18 }
 0x174   : > { %1686 = vmatmul.mubr.msk.bf16.vlgmr.msra.gmra.mxu1 %vm538_vm0, %v567_v20 }
 0x175   : > { %1690 = vmatpush3.bf16.msra.mxu1 %v1870_v19  ;;  %1693 = vmatprep.mubr.msk.bf16.mxu1 %vm2048_vm1, %v2047_v8 }
 0x176   : > { %1691 = vmatprep.subr.bf16.mxu1 %v2047_v8 }
 0x179   : > { %1692 = vmatpush3.bf16.msra.mxu1 %v1871_v21 }
 0x17a   : > { %1697 = vmatprep.subr.bf16.mxu1 %v2047_v8 }
 0x17c   : > { %1694 = vmatmul.mubr.msk.bf16.vlgmr.msra.gmra.mxu1 %vm538_vm0, %v567_v20 }
 0x17d   : > { %1699 = vmatprep.mubr.msk.bf16.mxu1 %vm2048_vm1, %v2047_v8 }
 0x234   : > { %v621_v22 = vpop.f32.mrf.mxu1 }
 0x235   : > { %v627_v23 = vmul.f32 0.17677669, %v621_v22 }
 0x236   : > { %v1687_v24 = vpop.f32.mrf.mxu1 }
 0x237   : > { %v628_v25 = vpack.c.bf16 %v627_v23, %v627_v23 }
 0x238   : > { %v624_v26 = vpop.f32.mrf.mxu1 }
 0x239   : > { %630 = vst.msk [vmem:[#allocation2] sm:$0xf] %vm629_vm2, %v628_v25 }
 0x23a   : > { %v1688_v27 = vpop.f32.mrf.mxu1 }
 0x23c   : > { %v681_v28 = vpop.f32.mrf.mxu1 }
 0x23d   : > { %v687_v29 = vpack.c.bf16 %v681_v28, %v681_v28 }
 0x23e   : > { %v1695_v30 = vpop.f32.mrf.mxu1 }
 0x23f   : > { %689 = vst.msk [vmem:[#allocation3] sm:$0xf] %vm688_vm3, %v687_v29 }
 0x240   : > { %v684_v31 = vpop.f32.mrf.mxu1  ;;  %v690_v32 = vld [vmem:[#allocation2] sm:$0xf] }
 0x241   : > { %692 = vrot.lane.b32.xlu0 %v690_v32, %s2049_s26 }
 0x242   : > { %v1696_v33 = vpop.f32.mrf.mxu1 }
 0x246   : > { %v2277_v34 = vld [vmem:[#allocation3] sm:$0xf] }
 0x247   : > { %700 = vrot.lane.b32.xlu1 %v2277_v34, %s2049_s26  ;;  %v711_v35 = vsel %vm706_vm4, %v2277_v34, 0  ;;  %v1607_v10 = vcombine.low %v2277_v34, %v2277_v34 }
 0x248   : > { %1698 = vmatpush3.bf16.xpose.msra.mxu1 %v711_v35 }
 0x249   : > { %1703 = vmatprep.subr.bf16.mxu1 %v2047_v8 }
 0x24b   : > { %702 = vrot.lane.b32.xlu1 %v2277_v34, %s2050_s27 }
 0x24f   : > { %704 = vrot.lane.b32.xlu1 %v2277_v34, %s2051_s28  ;;  %1700 = vmatmul.mubr.msk.bf16.vlgmr.msra.gmra.mxu1 %vm706_vm4, %v690_v32 }
 0x250   : > { %1705 = vmatprep.mubr.msk.bf16.mxu1 %vm2048_vm1, %v2047_v8 }
 0x253   : > { %694 = vrot.lane.b32.xlu1 %v690_v32, %s2050_s27 }
 0x257   : > { %696 = vrot.lane.b32.xlu1 %v690_v32, %s2051_s28  ;;  %s528_s28 = scalar_lea.vmem %s2461_s0, %s1593_s15 }
 0x2b3   : > { %v693_v40 = vpop.permute.xlu0 %692 }
 0x2b9   : > { %v701_v36 = vpop.permute.xlu1 %700 }
 0x2ba   : > { %v757_v37 = vsel %vm706_vm4, %v701_v36, 0  ;;  %v1609_v54 = vcombine.low %v701_v36, %v701_v36 }
 0x2bb   : > { %1704 = vmatpush3.bf16.xpose.msra.mxu1 %v757_v37 }
 0x2bc   : > { %1715 = vmatprep.subr.bf16.mxu1 %v2047_v8 }
 0x2bd   : > { %v703_v38 = vpop.permute.xlu1 %702 }
 0x2be   : > { %v803_v39 = vsel %vm706_vm4, %v703_v38, 0  ;;  %v1611_v12 = vcombine.low %v703_v38, %v703_v38 }
 0x2bf   : > { %1710 = vmatpush3.bf16.xpose.msra.mxu0 %v803_v39 }
 0x2c0   : > { %1721 = vmatprep.subr.bf16.mxu0 %v2047_v8 }
 0x2c1   : > { %v705_v41 = vpop.permute.xlu1 %704 }
 0x2c2   : > { %v849_v42 = vsel %vm706_vm4, %v705_v41, 0  ;;  %1706 = vmatmul.mubr.msk.bf16.vlgmr.msra.gmra.mxu1 %vm706_vm4, %v693_v40  ;;  %v1613_v13 = vcombine.low %v705_v41, %v705_v41 }
 0x2c3   : > { %1716 = vmatpush3.bf16.xpose.msra.mxu1 %v849_v42  ;;  %1717 = vmatprep.mubr.msk.bf16.mxu1 %vm2048_vm1, %v2047_v8 }
 0x2c4   : > { %1727 = vmatprep.subr.bf16.mxu1 %v2047_v8 }
 0x2c5   : > { %v695_v43 = vpop.permute.xlu1 %694 }
 0x2c6   : > { %1712 = vmatmul.mubr.msk.bf16.vlgmr.msra.gmra.mxu0 %vm706_vm4, %v695_v43 }
 0x2c7   : > { %1723 = vmatprep.mubr.msk.bf16.mxu0 %vm2048_vm1, %v2047_v8 }
 0x2c9   : > { %v697_v44 = vpop.permute.xlu1 %696 }
 0x2ca   : > { %1718 = vmatmul.mubr.msk.bf16.vlgmr.msra.gmra.mxu1 %vm706_vm4, %v697_v44 }
 0x2cb   : > { %1729 = vmatprep.mubr.msk.bf16.mxu1 %vm2048_vm1, %v2047_v8 }
 0x30f   : > { %v747_v48 = vpop.f32.mrf.mxu1 }
 0x310   : > { %v901_v49 = vsel %vm898_vm5, %v747_v48, -1e+30 }
 0x311   : > { %v1701_v50 = vpop.f32.mrf.mxu1  ;;  %v905_v51 = vsel %vm706_vm4, %v901_v49, -inf }
 0x312   : > { %906 = vmax.xlane.f32.xlu1 %v905_v51 }
 0x313   : > { %v750_v52 = vpop.f32.mrf.mxu1 }
 0x315   : > { %v1702_v53 = vpop.f32.mrf.mxu1 }
 0x323   : > { %998 = vrot.lane.b32.xlu1 %v1609_v54, %s2052_s24 }
 0x382   : > { %v793_v55 = vpop.f32.mrf.mxu1 }
 0x383   : > { %v902_v56 = vsel %vm898_vm5, %v793_v55, -1e+30 }
 0x384   : > { %v1707_v57 = vpop.f32.mrf.mxu1  ;;  %v908_v58 = vsel %vm706_vm4, %v902_v56, -inf }
 0x385   : > { %909 = vmax.xlane.f32.xlu0 %v908_v58  ;;  %v1873_v58 = vld [vmem:[%s2467_s6 + $0x8] sm:$0xff]  }
 0x386   : > { %v796_v59 = vpop.f32.mrf.mxu1  ;;  %v839_v60 = vpop.f32.mrf.mxu0 }
 0x387   : > { %v903_v61 = vsel %vm898_vm5, %v839_v60, -1e+30 }
 0x388   : > { %v1708_v62 = vpop.f32.mrf.mxu1  ;;  %v1713_v63 = vpop.f32.mrf.mxu0  ;;  %v911_v0 = vsel %vm706_vm4, %v903_v61, -inf }
 0x389   : > { %912 = vmax.xlane.f32.xlu1 %v911_v0 }
 0x38a   : > { %v842_v1 = vpop.f32.mrf.mxu0  ;;  %v885_v2 = vpop.f32.mrf.mxu1 }
 0x38b   : > { %v904_v3 = vsel %vm898_vm5, %v885_v2, -1e+30 }
 0x38c   : > { %v1714_v4 = vpop.f32.mrf.mxu0  ;;  %v1719_v5 = vpop.f32.mrf.mxu1  ;;  %v914_v6 = vsel %vm706_vm4, %v904_v3, -inf }
 0x38d   : > { %915 = vmax.xlane.f32.xlu1 %v914_v6 }
 0x38e   : > { %v888_v7 = vpop.f32.mrf.mxu1 }
 0x390   : > { %v1720_v9 = vpop.f32.mrf.mxu1 }
 0x39b   : > { %v907_v11 = vpop.xlane.xlu1 %906  ;;  %947 = vrot.lane.b32.xlu0 %v1607_v10, %s2052_s24 }
 0x39c   : > { %v917_v16 = vsub.f32 %v901_v49, %v907_v11 }
 0x39e   : > { %1048 = vrot.lane.b32.xlu1 %v1611_v12, %s2052_s24  ;;  %v921_v17 = vmul.f32 1.442695, %v917_v16 }
 0x39f   : > { %v999_v14 = vpop.permute.xlu1 %998  ;;  %1098 = vrot.lane.b32.xlu0 %v1613_v13, %s2052_s24  ;;  %s1638_s24 = sshll.u32 %s2033_s16, 7 }
 0x3a0   : > { %v1004_v15 = vsel %vm952_vm6, %v999_v14, 0  ;;  %1887 = vpow2.f32 %v921_v17  ;;  %s2414_s19 = scalar_lea.hbm %s2475_s14, %s1638_s24 }
 0x3a1   : > { %1728 = vmatpush3.bf16.msra.mxu1 %v1004_v15 }
 0x3a2   : > { %1739 = vmatprep.subr.bf16.mxu1 %v2047_v8 }
 0x3ad   : > { %v1888_v21 = vpop.eup %1887 }
 0x3ae   : > { %v941_v27 = vpack.c.bf16 %v1888_v21, %v1888_v21  ;;  %v929_v40 = vsel %vm706_vm4, %v1888_v21, 0.0  ;;  %v534_v21 = vld [vmem:[%s528_s28] sm:$0xff] }
 0x40e   : > { %v910_v18 = vpop.xlane.xlu0 %909 }
 0x40f   : > { %v918_v19 = vsub.f32 %v902_v56, %v910_v18 }
 0x411   : > { %v923_v20 = vmul.f32 1.442695, %v918_v19 }
 0x412   : > { %v913_v22 = vpop.xlane.xlu1 %912  ;;  %v948_v23 = vpop.permute.xlu0 %947 }
 0x413   : > { %1889 = vpow2.f32 %v923_v20  ;;  %v919_v24 = vsub.f32 %v903_v61, %v913_v22  ;;  %v954_v25 = vsel %vm952_vm6, %v948_v23, 0  ;;  %v1874_v61 = vld [vmem:[%s2467_s6] sm:$0xff]  }
 0x414   : > { %1722 = vmatpush3.bf16.msra.mxu0 %v954_v25  ;;  %v1618_v20 = vld [vmem:[%s2468_s7] ss:$0 sm:$0xff] }
 0x415   : > { %v925_v26 = vmul.f32 1.442695, %v919_v24  ;;  %1733 = vmatprep.subr.bf16.mxu0 %v2047_v8 }
 0x416   : > { %v916_v28 = vpop.xlane.xlu1 %915  ;;  %v1099_v34 = vpop.permute.xlu0 %1098 }
 0x417   : > { %1891 = vpow2.f32 %v925_v26  ;;  %v920_v29 = vsub.f32 %v904_v3, %v916_v28  ;;  %1724 = vmatmul.mubr.msk.bf16.vlgmr.msra.gmra.mxu0 %vm706_vm4, %v941_v27  ;;  %v1104_v37 = vsel %vm952_vm6, %v1099_v34, 0  ;;  %v1875_v34 = vld [vmem:[#allocation5 + $0x8] sm:$0xff]  }
 0x418   : > { %1735 = vmatprep.mubr.msk.bf16.mxu0 %vm2048_vm1, %v2047_v8 }
 0x419   : > { %v927_v30 = vmul.f32 1.442695, %v920_v29 }
 0x41a   : > { %v1049_v31 = vpop.permute.xlu1 %1048 }
 0x41b   : > { %1893 = vpow2.f32 %v927_v30  ;;  %v1054_v32 = vsel %vm952_vm6, %v1049_v31, 0 }
 0x41c   : > { %1734 = vmatpush3.bf16.msra.mxu0 %v1054_v32 }
 0x41d   : > { %1745 = vmatprep.subr.bf16.mxu0 %v2047_v8 }
 0x420   : > { %v1890_v33 = vpop.eup %1889 }
 0x421   : > { %v932_v35 = vsel %vm706_vm4, %v1890_v33, 0.0  ;;  %v942_v36 = vpack.c.bf16 %v1890_v33, %v1890_v33 }
 0x422   : > { %933 = vadd.xlane.f32.xlu1 %v932_v35  ;;  %v1876_v35 = vld [vmem:[#allocation5] sm:$0xff]  }
 0x423   : > { %1730 = vmatmul.mubr.msk.bf16.vlgmr.msra.gmra.mxu1 %vm706_vm4, %v942_v36  ;;  %v1877_v36 = vld [vmem:[%s2473_s12 + $0x38] sm:$0xff]  }
 0x424   : > { %v1892_v38 = vpop.eup %1891  ;;  %1740 = vmatpush3.bf16.msra.mxu1 %v1104_v37  ;;  %1741 = vmatprep.mubr.msk.bf16.mxu1 %vm2048_vm1, %v2047_v8  ;;  %v1878_v37 = vld [vmem:[%s2473_s12 + $0x30] sm:$0xff]  }
 0x425   : > { %v935_v39 = vsel %vm706_vm4, %v1892_v38, 0.0  ;;  %v943_v41 = vpack.c.bf16 %v1892_v38, %v1892_v38  ;;  %1753 = vmatprep.subr.bf16.mxu1 %v2047_v8  ;;  %v1879_v38 = vld [vmem:[%s2473_s12 + $0x28] sm:$0xff]  }
 0x426   : > { %936 = vadd.xlane.f32.xlu0 %v935_v39  ;;  %930 = vadd.xlane.f32.xlu1 %v929_v40  ;;  %v1880_v39 = vld [vmem:[%s2473_s12 + $0x20] sm:$0xff]   ;;  %v1881_v40 = vld [vmem:[%s2473_s12 + $0x18] sm:$0xff]  }
 0x427   : > { %1736 = vmatmul.mubr.msk.bf16.vlgmr.msra.gmra.mxu0 %vm706_vm4, %v943_v41  ;;  %v1882_v41 = vld [vmem:[%s2473_s12 + $0x10] sm:$0xff]  }
 0x428   : > { %v1894_v42 = vpop.eup %1893  ;;  %1749 = vmatprep.mubr.msk.bf16.mxu0 %vm2048_vm1, %v2047_v8  ;;  %1746 = vmatpush3.bf16.msra.mxu0 %v1873_v58 }
 0x429   : > { %v938_v43 = vsel %vm706_vm4, %v1894_v42, 0.0  ;;  %v944_v44 = vpack.c.bf16 %v1894_v42, %v1894_v42  ;;  %1747 = vmatprep.subr.bf16.mxu0 %v2047_v8 }
 0x42a   : > { %939 = vadd.xlane.f32.xlu0 %v938_v43 }
 0x42b   : > { %1742 = vmatmul.mubr.msk.bf16.vlgmr.msra.gmra.mxu1 %vm706_vm4, %v944_v44 }
 0x42c   : > { %1757 = vmatprep.mubr.msk.bf16.mxu1 %vm2048_vm1, %v2047_v8  ;;  %1748 = vmatpush3.bf16.msra.mxu0 %v1874_v61 }
 0x42d   : > { %1761 = vmatprep.subr.bf16.mxu0 %v2047_v8  ;;  %1754 = vmatpush3.bf16.msra.mxu1 %v1875_v34 }
 0x42e   : > { %1755 = vmatprep.subr.bf16.mxu1 %v2047_v8 }
 0x431   : > { %1756 = vmatpush3.bf16.msra.mxu1 %v1876_v35 }
 0x4ab   : > { %v934_v45 = vpop.xlane.xlu1 %933 }
 0x4af   : > { %v931_v46 = vpop.xlane.xlu1 %930  ;;  %v937_v47 = vpop.xlane.xlu0 %936 }
 0x4b0   : > { %1895 = vrcp.f32 %v931_v46  ;;  %v1622_v46 = vld [vmem:[%s2469_s8] ss:$0 sm:$0xff] }
 0x4b1   : > { %1897 = vrcp.f32 %v934_v45 }
 0x4b2   : > { %1899 = vrcp.f32 %v937_v47 }
 0x4b3   : > { %v940_v53 = vpop.xlane.xlu0 %939 }
 0x4b4   : > { %1901 = vrcp.f32 %v940_v53  ;;  %v1884_v53 = vld [vmem:[%s2473_s12] sm:$0xff]  }
 0x4bd   : > { %v1896_v48 = vpop.eup %1895 }
 0x4be   : > { %v1898_v56 = vpop.eup %1897 }
 0x4bf   : > { %v1900_v63 = vpop.eup %1899 }
 0x4c1   : > { %v1902_v6 = vpop.eup %1901 }
 0x4d7   : > { %v990_v49 = vpop.f32.mrf.mxu0 }
 0x4d8   : > { %v1150_v50 = vmul.f32 %v1896_v48, %v990_v49  ;;  %v1623_v48 = vld [vmem:[%s2470_s9] ss:$0 sm:$0xff] }
 0x4d9   : > { %v1725_v51 = vpop.f32.mrf.mxu0 }
 0x4da   : > { %v1154_v52 = vpack.c.bf16 %v1150_v50, %v1150_v50 }
 0x4db   : > { %v993_v54 = vpop.f32.mrf.mxu0 }
 0x4dc   : > { %1159 = vst.msk [vmem:[#allocation4] sm:$0xf] %vm1158_vm7, %v1154_v52  ;;  %v1883_v52 = vld [vmem:[%s2473_s12 + $0x8] sm:$0xff]   ;;  %v1624_v54 = vld [vmem:[#allocation8] ss:$0 sm:$0xff] }
 0x4dd   : > { %v1726_v55 = vpop.f32.mrf.mxu0 }
 0x4e3   : > { %v1040_v57 = vpop.f32.mrf.mxu1 }
 0x4e4   : > { %v1151_v59 = vmul.f32 %v1898_v56, %v1040_v57 }
 0x4e5   : > { %v1731_v60 = vpop.f32.mrf.mxu1 }
 0x4e6   : > { %v1641_v62 = vpack.c.bf16 %v1151_v59, %v1151_v59 }
 0x4e7   : > { %v1043_v0 = vpop.f32.mrf.mxu1  ;;  %v1090_v1 = vpop.f32.mrf.mxu0 }
 0x4e8   : > { %v1152_v2 = vmul.f32 %v1900_v63, %v1090_v1  ;;  %1163 = vrot.lane.b32.xlu0 %v1641_v62, %s2053_s18  ;;  %s2056_s18 = smov [#allocation10]  }
 0x4e9   : > { %v1732_v3 = vpop.f32.mrf.mxu1  ;;  %v1737_v4 = vpop.f32.mrf.mxu0 }
 0x4ea   : > { %v1642_v5 = vpack.c.bf16 %v1152_v2, %v1152_v2 }
 0x4eb   : > { %v1093_v7 = vpop.f32.mrf.mxu0  ;;  %v1140_v9 = vpop.f32.mrf.mxu1 }
 0x4ec   : > { %v1153_v10 = vmul.f32 %v1902_v6, %v1140_v9  ;;  %1171 = vrot.lane.b32.xlu1 %v1642_v5, %s2054_s21  ;;  %s1961_s21 = sshll.u32 %s2056_s18, 4  ;;  %s1962_s21 = int_to_ptr.vmem [resolvable:$false] %s1961_s21 }
 0x4ed   : > { %v1738_v11 = vpop.f32.mrf.mxu0  ;;  %v1743_v12 = vpop.f32.mrf.mxu1 }
 0x4ee   : > { %v1643_v13 = vpack.c.bf16 %v1153_v10, %v1153_v10 }
 0x4ef   : > { %v1143_v14 = vpop.f32.mrf.mxu1 }
 0x4f0   : > { %1179 = vrot.lane.b32.xlu1 %v1643_v13, %s2055_s25  ;;  %s519_s25 = sand.u32 1, %s2025_s30  }
 0x4f1   : > { %v1744_v15 = vpop.f32.mrf.mxu1  ;;  %s1592_s26 = sshll.u32 %s519_s25, 3  ;;  %s1464_s16 = scalar_lea.sflag [#allocation7], %s519_s25 }
 0x4f2   : > { %s521_s20 = scalar_lea.vmem [#allocation10], %s1592_s26  ;;  %s1963_s26 = scalar_lea.vmem %s1962_s21, 256 }
 0x4f3   : > { %s1478_s29 = sshll.u32 %s521_s20, 4  ;;  %s2416_s29 = int_to_ptr.vmem [resolvable:$true] %s1478_s29 }
 0x4f4   : > { %s1957_s17 = scalar_lea.vmem %s2416_s29, 128  ;;  %p1964_p0 = scmp.lt.s32.totalorder %s2416_s29, %s1962_s21 }
 0x4f5   : > { %p1958_p10 = scmp.ne.s32.totalorder %s2416_s29, %s1957_s17  ;;  %p1965_p7 = scmp.lt.s32.totalorder %s1963_s26, %s1957_s17 }
 0x4f7   : > { %p1959_p11 = pnand %p1958_p10, %p2172_p4  ;;  %p1966_p9 = por %p1965_p7, %p1964_p0 }
 0x4f9   : > { %p1960_p13 = pneg %p1959_p11 }
 0x4fb   : > { %p1967_p12 = pnand %p1966_p9, %p1960_p13 }
 0x55a   : > { %v1164_v16 = vpop.permute.xlu0 %1163 }
 0x55b   : > { %1167 = vst.msk [vmem:[#allocation4] sm:$0xf] %vm1166_vm8, %v1164_v16 }
 0x55e   : > { %v1172_v17 = vpop.permute.xlu1 %1171 }
 0x55f   : > { %1175 = vst.msk [vmem:[#allocation4] sm:$0xf] %vm1174_vm9, %v1172_v17 }
 0x562   : > { %v1180_v18 = vpop.permute.xlu1 %1179 }
 0x563   : > { %1183 = vst.msk [vmem:[#allocation4] sm:$0xf] %vm1182_vm10, %v1180_v18 }
 0x56a   : > { %v1184_v19 = vld [vmem:[#allocation4] sm:$0xf] }
 0x56b   : > { %1750 = vmatmul.mubr.msk.bf16.vlgmr.msra.gmra.mxu0 %vm538_vm0, %v1184_v19 }
 0x56c   : > { %1777 = vmatprep.mubr.msk.bf16.mxu0 %vm2048_vm1, %v2047_v8  ;;  %1762 = vmatpush3.bf16.msra.mxu0 %v1877_v36 }
 0x56d   : > { %1763 = vmatprep.subr.bf16.mxu0 %v2047_v8 }
 0x570   : > { %1764 = vmatpush3.bf16.msra.mxu0 %v1878_v37 }
 0x571   : > { %1765 = vmatprep.subr.bf16.mxu0 %v2047_v8 }
 0x574   : > { %1766 = vmatpush3.bf16.msra.mxu0 %v1879_v38 }
 0x575   : > { %1767 = vmatprep.subr.bf16.mxu0 %v2047_v8 }
 0x578   : > { %1768 = vmatpush3.bf16.msra.mxu0 %v1880_v39 }
 0x579   : > { %1769 = vmatprep.subr.bf16.mxu0 %v2047_v8 }
 0x57c   : > { %1770 = vmatpush3.bf16.msra.mxu0 %v1881_v40 }
 0x57d   : > { %1771 = vmatprep.subr.bf16.mxu0 %v2047_v8 }
 0x580   : > { %1772 = vmatpush3.bf16.msra.mxu0 %v1882_v41 }
 0x581   : > { %1773 = vmatprep.subr.bf16.mxu0 %v2047_v8 }
 0x584   : > { %1774 = vmatpush3.bf16.msra.mxu0 %v1883_v52 }
 0x585   : > { %1775 = vmatprep.subr.bf16.mxu0 %v2047_v8  ;;  %v1628_v8 = vld [vmem:[%s2474_s13] ss:$0 sm:$0xff] }
 0x588   : > { %1776 = vmatpush3.bf16.msra.mxu0 %v1884_v53 }
 0x62b   : > { %v1245_v22 = vpop.f32.mrf.mxu0 }
 0x62c   : > { %v1246_v23 = vadd.f32 %v1618_v20, %v1245_v22 }
 0x62d   : > { %v1751_v24 = vpop.f32.mrf.mxu0 }
 0x62e   : > { %v2360_v25 = vadd.f32 %v1246_v23, %v534_v21 }
 0x62f   : > { %v1248_v26 = vpop.f32.mrf.mxu0 }
 0x630   : > { %v1254_v27 = vsel %vm538_vm0, %v2360_v25, 0.0 }
 0x631   : > { %v1752_v28 = vpop.f32.mrf.mxu0  ;;  %1255 = vadd.xlane.f32.xlu0 %v1254_v27 }
 0x6ba   : > { %v1256_v29 = vpop.xlane.xlu0 %1255 }
 0x6bb   : > { %v1257_v30 = vmul.f32 0.03125, %v1256_v29 }
 0x6bd   : > { %v1258_v31 = vsub.f32 %v2360_v25, %v1257_v30 }
 0x6bf   : > { %v1259_v32 = vmul.f32 %v1258_v31, %v1258_v31 }
 0x6c1   : > { %v1260_v33 = vsel %vm538_vm0, %v1259_v32, 0.0 }
 0x6c2   : > { %1261 = vadd.xlane.f32.xlu1 %v1260_v33 }
 0x74b   : > { %v1262_v42 = vpop.xlane.xlu1 %1261 }
 0x74c   : > { %v1263_v43 = vmul.f32 0.03125, %v1262_v42 }
 0x74e   : > { %v1264_v44 = vadd.f32 1e-05, %v1263_v43 }
 0x750   : > { %1903 = vrsqrt.f32 %v1264_v44 }
 0x75d   : > { %v1904_v45 = vpop.eup %1903 }
 0x75e   : > { %v1266_v47 = vmul.f32 %v1904_v45, %v1258_v31 }
 0x760   : > { %v1273_v49 = vmul.f32 %v1622_v46, %v1266_v47 }
 0x762   : > { %v1280_v50 = vadd.f32 %v1623_v48, %v1273_v49 }
 0x764   : > { %v1281_v51 = vpack.c.bf16 %v1280_v50, %v1280_v50 }
 0x766   : > { %1758 = vmatmul.mubr.msk.bf16.vlgmr.msra.gmra.mxu1 %vm538_vm0, %v1281_v51 }
 0x826   : > { %v1342_v55 = vpop.f32.mrf.mxu1 }
 0x827   : > { %v1343_v56 = vadd.f32 %v1624_v54, %v1342_v55 }
 0x828   : > { %v1759_v57 = vpop.f32.mrf.mxu1 }
 0x829   : > { %v1348_v58 = vmax.f32 %v1343_v56, 0.0 }
 0x82a   : > { %v1345_v59 = vpop.f32.mrf.mxu1 }
 0x82b   : > { %v1349_v60 = vpack.c.bf16 %v1348_v58, %v1348_v58 }
 0x82c   : > { %v1760_v61 = vpop.f32.mrf.mxu1 }
 0x82d   : > { %1778 = vmatmul.mubr.bf16.vlgmr.msra.gmra.mxu0 %v1349_v60 }
 0x8ed   : > { %v1455_v62 = vpop.f32.mrf.mxu0 }
 0x8ee   : > { %v1456_v63 = vadd.f32 %v1628_v8, %v1455_v62 }
 0x8ef   : > { %v1779_v0 = vpop.f32.mrf.mxu0 }
 0x8f0   : > { %v1461_v1 = vadd.f32 %v1456_v63, %v2360_v25 }
 0x8f1   : > { %v1458_v2 = vpop.f32.mrf.mxu0 }
 0x8f2   : > { %1462 = vst.msk [vmem:[%s521_s20] sm:$0xff] %vm538_vm0, %v1461_v1 }
 0x8f3   : > { %v1780_v3 = vpop.f32.mrf.mxu0 }
 0x8f4   : > { %1970 = shalt.err (!%p1967_p12)
}
 0x8f5   : > { %s1971_s27 = scalar_lea.hbm %s2414_s19, 128  ;;  %s1975_s24 = scalar_lea.hbm %s2475_s14, 256 }
 0x8f6   : > { %p1972_p1 = scmp.ne.s32.totalorder %s2414_s19, %s1971_s27  ;;  %p1976_p3 = scmp.lt.s32.totalorder %s2414_s19, %s2475_s14 }
 0x8f7   : > { %p1977_p6 = scmp.lt.s32.totalorder %s1975_s24, %s1971_s27 }
 0x8f8   : > { %p1973_p2 = pnand %p1972_p1, %p2172_p4 }
 0x8f9   : > { %p1978_p8 = por %p1977_p6, %p1976_p3 }
 0x8fa   : > { %p1974_p5 = pneg %p1973_p2 }
 0x8fc   : > { %p1979_p10 = pnand %p1978_p8, %p1974_p5 }
 0x8fe   : > { %1982 = shalt.err (!%p1979_p10)
}
 0x8ff   : > { %1789 = dma.vmem_to_hbm [thread:$0]  (%p2172_p4), %s2416_s29, 128, %s2414_s19, %s1464_s16  }
 0x900 PF: > { %s2495_s22 = sld [smem:[#allocation17_spill]] }
 0x901   : > { %s2496_s17 = sld [smem:[#allocation14_spill]] }
 0x902   : > { %s2497_s18 = sld [smem:[#allocation19_spill]] }
 0x906   : > { %p1806_p11 = scmp.ge.s32.totalorder %s2495_s22, 2 }
 0x907   : > { %s1490_s21 = sand.u32 1, %s2496_s17  }
 0x908   : > { %p2498_p13 = scmp.ne.s32.totalorder %s2497_s18, 0  ;;  %s1491_s26 = scalar_lea.sflag [#allocation7], %s1490_s21 }
 0x90a   : > { %p1799_p0 = pnand %p1806_p11, %p2498_p13 }
 0x90c   : > { %p1800_p7 = pneg %p1799_p0 }
 0x90e   : > { %2016 = dma.done.wait (%p1800_p7), %s1491_s26, 128  }
 0x90f   : > { %2018 = vsyncadd (%p1800_p7), %s1491_s26, 4294967168  ;;  %s29_s18 = sadd.s32 1, %s2495_s22   ;;  %s2499_s23 = sld [smem:[#allocation15_spill]] }
 0x910   : > { %p26_p9 = scmp.ge.s32.totalorder %s29_s18, 4   ;;  %s2500_s15 = sld [smem:[#allocation20_spill]] }
 0x911   : > { %s2501_s16 = sld [smem:[#allocation16_spill]]  ;;  %s2503_s29 = smov %s2025_s30 }
 0x912   : > { %s2502_s17 = sld [smem:[#allocation18_spill]]  ;;  %28 = sbr.rel (!%p26_p9) target bundleno = 6 (0x6), region = 123 }
 0x915   : > { %s2504_s30 = smov %s2499_s23 }
 0x917   :  { %1496 = vsyncpa [#allocation6], 1 }
 0x918   :  { %1498 = vsyncpa [#allocation6 + $0x1], 1 }
 0x919   :  { %1499 = vsyncpa [#allocation9], 1 }
 0x91a   :  { %1500 = vsyncpa [#allocation7], 1 }
 0x91b   :  { %1502 = vsyncpa [#allocation7 + $0x1], 1 }

</bundles_post_ra>
